<compile_context>
chip_gen: v7x
topology: tpu7x:2x2x1
jax: 0.10.0
libtpu: 0.0.40
codegen_flags: <defaults>
</compile_context>

<pallas_src>
import jax
import jax.numpy as jnp
from jax.experimental import pallas as pl
from jax.experimental.pallas import tpu as pltpu


def _round_up(n, m):
    return pl.cdiv(n, m) * m


def _vmem_budget_bytes():
    """VMEM we allow the kernel to use, derived from the actual chip."""
    try:
        cap = int(pltpu.get_tpu_info().vmem_capacity_bytes)
    except Exception:
        cap = 64 * 1024 * 1024  # conservative fallback = v7x per-TensorCore VMEM
    # Leave headroom for compiler-internal scratch; never request > ~100 MiB
    # (v5e/v6e: 128 MiB physical, v7x: 64 MiB per TensorCore).
    return min(int(cap * 0.8), 100 * 1024 * 1024)


def mlp_kernel(x_ref, w1_ref, b1_ref, w2_ref, b2_ref, o_ref):
    # fc1 on the MXU (bf16 or f32 inputs), f32 accumulation; bias + ReLU in f32.
    h = jnp.dot(x_ref[...], w1_ref[...], preferred_element_type=jnp.float32)
    h = jnp.maximum(h + b1_ref[...], 0.0)                      # (tb, Hp) f32

    # fc2 (H -> 1): VPU multiply by the broadcast w2 row + XLU lane reduction.
    # Avoids the degenerate N=1 / transposed-activation MXU matmul; VPU and XLU
    # slots are idle relative to the fc1 matmul, so this is effectively free.
    logits = jnp.sum(h * w2_ref[...], axis=-1, keepdims=True) + b2_ref[0]  # (tb, 1)
    o_ref[...] = jax.nn.sigmoid(logits).astype(o_ref.dtype)


def prepare_params(w1, b1, w2, b2, *, use_bf16=False):
    """Pad H to a 128-multiple and lay weights out for the kernel.

    Done ONCE (hoisted out of the per-call path).  D is left unpadded so x can
    stream through the kernel without any host-side copy.  Padded hidden units
    are exactly zero after ReLU and padded w2 entries are zero, so the result
    is exact.
    """
    D, H = w1.shape
    Hp = _round_up(H, 128)
    w_dtype = jnp.bfloat16 if use_bf16 else jnp.float32
    w1p = jnp.zeros((D, Hp), w_dtype).at[:, :H].set(w1.astype(w_dtype))
    b1p = jnp.zeros((1, Hp), jnp.float32).at[:, :H].set(
        jnp.asarray(b1, jnp.float32).reshape(1, H))
    w2p = jnp.zeros((1, Hp), jnp.float32).at[:, :H].set(
        jnp.asarray(w2, jnp.float32).reshape(1, H))
    b2s = jnp.asarray(b2, jnp.float32).reshape((1,))
    return w1p, b1p, w2p, b2s


def mlp_forward(x, w1p, b1p, w2p, b2s, *, tb=None, use_bf16=False):
    """x: (B, D) -> (B, 1).  w1p/b1p/w2p/b2s from prepare_params()."""
    B, D = x.shape
    Dw, Hp = w1p.shape
    assert Dw == D, "w1 first dim must match x feature dim"

    if use_bf16 and x.dtype != jnp.bfloat16:
        # Ideally keep x in bf16 upstream; this cast is the only extra copy.
        x = x.astype(jnp.bfloat16)

    elt_x = jnp.dtype(x.dtype).itemsize
    elt_w = jnp.dtype(w1p.dtype).itemsize

    budget = _vmem_budget_bytes()
    # Conservative: count 2 buffers per input (Pallas double-buffers).
    resident_bytes = 2 * (D * Hp * elt_w + Hp * 4 + Hp * 4)
    per_row_bytes = 2 * D * elt_x + Hp * 4 + 2 * 4   # x (2 bufs) + h + out (2 bufs)

    if tb is None:
        leftover = budget - resident_bytes
        if leftover < per_row_bytes * 8:
            # TODO(synk): if w1 alone cannot stay VMEM-resident (very large D*H,
            # v7x 64 MiB/TC), add an H (or K=D) grid axis ('arbitrary') with an
            # f32 accumulator scratch instead of failing here.
            tb = 8
        else:
            tb = min(1024, leftover // per_row_bytes)
        # Ensure >= 2 batch tiles when B allows it, so the "parallel" axis
        # actually splits across both v7x TensorCores.
        tb = min(tb, _round_up(pl.cdiv(B, 2), 8))
        tb = max(8, (tb // 8) * 8)
    tb = int(min(tb, _round_up(B, 8)))

    grid = (pl.cdiv(B, tb),)

    out = pl.pallas_call(
        mlp_kernel,
        out_shape=jax.ShapeDtypeStruct((B, 1), jnp.float32),
        grid=grid,
        in_specs=[
            pl.BlockSpec((tb, D), lambda i: (i, 0)),        # x tile (streamed, no copy)
            pl.BlockSpec((D, Hp), lambda i: (0, 0)),        # w1 (VMEM-resident)
            pl.BlockSpec((1, Hp), lambda i: (0, 0)),        # b1 (resident)
            pl.BlockSpec((1, Hp), lambda i: (0, 0)),        # w2 row (resident)
            pl.BlockSpec(memory_space=pltpu.MemorySpace.SMEM),  # b2 scalar
        ],
        out_specs=pl.BlockSpec((tb, 1), lambda i: (i, 0)),  # (B, 1) column; OOB rows masked
        compiler_params=pltpu.CompilerParams(
            dimension_semantics=("parallel",),
            vmem_limit_bytes=int(budget),
        ),
    )(x, w1p, b1p, w2p, b2s)

    return out


def init_params(key, input_size, hidden_size):
    """Deterministic init mirroring nn.Linear shapes (weights stored transposed)."""
    k1, k2, k3, k4 = jax.random.split(key, 4)
    bound1 = 1.0 / jnp.sqrt(input_size)
    bound2 = 1.0 / jnp.sqrt(hidden_size)
    w1 = jax.random.uniform(k1, (input_size, hidden_size), jnp.float32, -bound1, bound1)
    b1 = jax.random.uniform(k2, (1, hidden_size), jnp.float32, -bound1, bound1)
    w2 = jax.random.uniform(k3, (hidden_size, 1), jnp.float32, -bound2, bound2)
    b2 = jax.random.uniform(k4, (1, 1), jnp.float32, -bound2, bound2)
    return w1, b1, w2, b2


def _reference(x, w1, b1, w2, b2):
    hi = jax.lax.Precision.HIGHEST
    h = jnp.maximum(jnp.dot(x, w1, precision=hi) + b1, 0.0)
    return jax.nn.sigmoid(jnp.dot(h, w2, precision=hi) + b2)


if __name__ == "__main__":
    key = jax.random.PRNGKey(0)

    # --- small-shape f32 check (tight tolerance) ------------------------------
    batch, input_size, hidden_size = 8, 16, 32
    kx, kp, kx2, kp2 = jax.random.split(key, 4)
    x = jax.random.normal(kx, (batch, input_size), jnp.float32)
    w1, b1, w2, b2 = init_params(kp, input_size, hidden_size)

    params = prepare_params(w1, b1, w2, b2, use_bf16=False)
    out = mlp_forward(x, *params, use_bf16=False)
    out = jax.block_until_ready(out)

    ref = _reference(x, w1, b1, w2, b2)
    assert out.shape == (batch, 1)
    assert jnp.allclose(out, ref, atol=1e-5, rtol=1e-5), float(jnp.abs(out - ref).max())

    # --- larger bf16 streaming check (multiple tiles, partial last tile) ------
    B2, D2, H2 = 500, 128, 256
    x2 = jax.random.normal(kx2, (B2, D2), jnp.float32)
    w1b, b1b, w2b, b2b = init_params(kp2, D2, H2)
    params_bf16 = prepare_params(w1b, b1b, w2b, b2b, use_bf16=True)
    out2 = mlp_forward(x2, *params_bf16, use_bf16=True)
    out2 = jax.block_until_ready(out2)

    ref2 = _reference(x2, w1b, b1b, w2b, b2b)
    assert out2.shape == (B2, 1)
    assert bool(jnp.all(jnp.isfinite(out2)))
    assert jnp.allclose(out2, ref2, atol=5e-2), float(jnp.abs(out2 - ref2).max())

    print("KERNEL_OK")
</pallas_src>

<mosaic_0001>
module attributes {stable_mosaic.version = 11 : i64} {
  func.func @mlp_kernel(%arg0: i32, %arg1: memref<8x16xf32, #tpu.memory_space<vmem>>, %arg2: memref<16x128xf32, #tpu.memory_space<vmem>>, %arg3: memref<1x128xf32, #tpu.memory_space<vmem>>, %arg4: memref<1x128xf32, #tpu.memory_space<vmem>>, %arg5: memref<1xf32, #tpu.memory_space<smem>>, %arg6: memref<8x1xf32, #tpu.memory_space<vmem>>) attributes {dimension_semantics = [#tpu.dimension_semantics<parallel>], iteration_bounds = array<i64: 1>, scalar_prefetch = 0 : i64, scratch_operands = 0 : i64, tpu.core_type = #tpu.core_type<tc>, window_params = [{transform_indices = @transform_0, window_bounds = array<i64: 8, 16>}, {pipeline_mode = #tpu.pipeline_mode<synchronous>, transform_indices = @transform_1, window_bounds = array<i64: 16, 128>}, {pipeline_mode = #tpu.pipeline_mode<synchronous>, transform_indices = @transform_2, window_bounds = array<i64: 1, 128>}, {pipeline_mode = #tpu.pipeline_mode<synchronous>, transform_indices = @transform_3, window_bounds = array<i64: 1, 128>}, {transform_indices = @transform_4, window_bounds = array<i64: 1>}, {transform_indices = @transform_5, window_bounds = array<i64: 8, 1>}]} {
    %c0 = arith.constant 0 : index
    %c0_0 = arith.constant 0 : index
    %0 = vector.load %arg1[%c0, %c0_0] : memref<8x16xf32, #tpu.memory_space<vmem>>, vector<8x16xf32>
    %c0_1 = arith.constant 0 : index
    %c0_2 = arith.constant 0 : index
    %1 = vector.load %arg2[%c0_1, %c0_2] : memref<16x128xf32, #tpu.memory_space<vmem>>, vector<16x128xf32>
    %cst = arith.constant dense<0.000000e+00> : vector<8x128xf32>
    %2 = tpu.matmul %0, %1, %cst {dimension_numbers = #tpu.dot_dimension_numbers<[1], [0], [0], [1], [0, 0, 1, 1], [], []>} : vector<8x16xf32>, vector<16x128xf32>, vector<8x128xf32> -> vector<8x128xf32>
    %c0_3 = arith.constant 0 : index
    %c0_4 = arith.constant 0 : index
    %3 = vector.load %arg3[%c0_3, %c0_4] : memref<1x128xf32, #tpu.memory_space<vmem>>, vector<1x128xf32>
    %4 = vector.broadcast %3 : vector<1x128xf32> to vector<8x128xf32>
    %5 = arith.addf %2, %4 : vector<8x128xf32>
    %cst_5 = arith.constant 0.000000e+00 : f32
    %6 = vector.broadcast %cst_5 : f32 to vector<8x128xf32>
    %7 = arith.maximumf %5, %6 : vector<8x128xf32>
    %c0_6 = arith.constant 0 : index
    %c0_7 = arith.constant 0 : index
    %8 = vector.load %arg4[%c0_6, %c0_7] : memref<1x128xf32, #tpu.memory_space<vmem>>, vector<1x128xf32>
    %9 = vector.broadcast %8 : vector<1x128xf32> to vector<8x128xf32>
    %10 = arith.mulf %7, %9 : vector<8x128xf32>
    %cst_8 = arith.constant dense<0.000000e+00> : vector<8xf32>
    %11 = vector.multi_reduction <add>, %10, %cst_8 [1] : vector<8x128xf32> to vector<8xf32>
    %12 = vector.shape_cast %11 : vector<8xf32> to vector<8x1xf32>
    %c0_9 = arith.constant 0 : index
    %13 = memref.load %arg5[%c0_9] : memref<1xf32, #tpu.memory_space<smem>>
    %14 = vector.broadcast %13 : f32 to vector<8x1xf32>
    %15 = arith.addf %12, %14 : vector<8x1xf32>
    %16 = arith.negf %15 : vector<8x1xf32>
    %17 = math.exp %16 : vector<8x1xf32>
    %cst_10 = arith.constant 1.000000e+00 : f32
    %18 = vector.broadcast %cst_10 : f32 to vector<8x1xf32>
    %19 = arith.addf %18, %17 : vector<8x1xf32>
    %20 = arith.divf %18, %19 : vector<8x1xf32>
    %c0_11 = arith.constant 0 : index
    %c0_12 = arith.constant 0 : index
    %21 = vector.load %arg6[%c0_11, %c0_12] : memref<8x1xf32, #tpu.memory_space<vmem>>, vector<8x1xf32>
    tpu.vector_store %arg6[%c0_11, %c0_12], %20 {strides = array<i32>} : memref<8x1xf32, #tpu.memory_space<vmem>>, vector<8x1xf32>,
    return
  }
  func.func @transform_0(%arg0: i32) -> (i32, i32) {
    %c0_i32 = arith.constant 0 : i32
    %c0_i32_0 = arith.constant 0 : i32
    return %arg0, %c0_i32 : i32, i32
  }
  func.func @transform_1(%arg0: i32) -> (i32, i32) {
    %c0_i32 = arith.constant 0 : i32
    %c0_i32_0 = arith.constant 0 : i32
    %c0_i32_1 = arith.constant 0 : i32
    return %c0_i32, %c0_i32_0 : i32, i32
  }
  func.func @transform_2(%arg0: i32) -> (i32, i32) {
    %c0_i32 = arith.constant 0 : i32
    %c0_i32_0 = arith.constant 0 : i32
    %c0_i32_1 = arith.constant 0 : i32
    return %c0_i32, %c0_i32_0 : i32, i32
  }
  func.func @transform_3(%arg0: i32) -> (i32, i32) {
    %c0_i32 = arith.constant 0 : i32
    %c0_i32_0 = arith.constant 0 : i32
    %c0_i32_1 = arith.constant 0 : i32
    return %c0_i32, %c0_i32_0 : i32, i32
  }
  func.func @transform_4(%arg0: i32) -> i32 {
    %c0_i32 = arith.constant 0 : i32
    %c0_i32_0 = arith.constant 0 : i32
    return %c0_i32 : i32
  }
  func.func @transform_5(%arg0: i32) -> (i32, i32) {
    %c0_i32 = arith.constant 0 : i32
    %c0_i32_0 = arith.constant 0 : i32
    return %arg0, %c0_i32 : i32, i32
  }
}

</mosaic_0001>

<bundles_post_ra>
// kernel: tpu_custom_call.1
= control target key start
LH: loop header
LB: loop body
LE: loop exit
PB: predicated region body
PF: predicated region fallthrough
CT: control target
= control target key end

     0   :  { %11 = vsyncpa [#allocation4], 0  ;;  %s315_s0 = inlined_call_operand.hbm [shape: f32[8,16], index: 0, kind: input, shape index: {}]   ;;  %s316_s1 = inlined_call_operand.hbm [shape: f32[16,128], index: 1, kind: input, shape index: {}]   ;;  %s317_s2 = inlined_call_operand.vmem [shape: f32[1,128], index: 2, kind: input, shape index: {}]   ;;  %s318_s3 = inlined_call_operand.vmem [shape: f32[1,128], index: 3, kind: input, shape index: {}]   ;;  %s319_s4 = inlined_call_operand.<no memory space> [shape: f32[1], index: 4, kind: input, shape index: {}]   ;;  %s320_s5 = inlined_call_operand.vmem [shape: f32[8,1], index: 5, kind: output, shape index: {}]  }
   0x1   :  { %12 = vsyncpa [#allocation6], 0  ;;  %s235_s18 = smov [#allocation3]   ;;  %s236_s20 = smov [#allocation5]  }
   0x2   :  { %s19_s19 = sshll.u32 %s235_s18, 4  ;;  %s28_s21 = sshll.u32 %s236_s20, 4  ;;  %s20_s19 = int_to_ptr.vmem [resolvable:$true] %s19_s19  ;;  %s272_s21 = int_to_ptr.vmem [resolvable:$true] %s28_s21 }
   0x3   :  { %s187_s24 = scalar_lea.hbm %s315_s0, 128 }
   0x4   :  { %p188_p0 = scmp.ne.s32.totalorder %s315_s0, %s187_s24  ;;  %p191_p1 = scmp.lt.u32.totalorder %s187_s24, %s315_s0 }
   0x6   :  { %p193_p2 = pnand %p191_p1, %p188_p0 }
   0x8   :  { %196 = shalt.err (!%p193_p2)
}
   0x9   :  { %s197_s29 = scalar_lea.vmem %s20_s19, 128  ;;  %p202_p4 = scmp.lt.s32.totalorder %s20_s19, %s20_s19 }
   0xa   :  { %p198_p3 = scmp.ne.s32.totalorder %s20_s19, %s197_s29  ;;  %p203_p5 = scmp.lt.s32.totalorder %s197_s29, %s197_s29 }
   0xc   :  { %p204_p6 = por %p203_p5, %p202_p4 }
   0xe   :  { %p205_p7 = pnand %p204_p6, %p198_p3 }
  0x10   :  { %208 = shalt.err (!%p205_p7)
}
  0x11   :  { %22 = dma.hbm_to_vmem [thread:$0]  %s315_s0, 128, %s20_s19, [#allocation4]  }
  0x12   :  { %s209_s9 = scalar_lea.hbm %s316_s1, 256 }
  0x13   :  { %p210_p8 = scmp.ne.s32.totalorder %s316_s1, %s209_s9  ;;  %p213_p9 = scmp.lt.u32.totalorder %s209_s9, %s316_s1 }
  0x15   :  { %p215_p10 = pnand %p213_p9, %p210_p8 }
  0x17   :  { %218 = shalt.err (!%p215_p10)
}
  0x18   :  { %s219_s14 = scalar_lea.vmem %s272_s21, 256  ;;  %p224_p12 = scmp.lt.s32.totalorder %s272_s21, %s272_s21 }
  0x19   :  { %p220_p11 = scmp.ne.s32.totalorder %s272_s21, %s219_s14  ;;  %p225_p13 = scmp.lt.s32.totalorder %s219_s14, %s219_s14 }
  0x1b   :  { %p226_p0 = por %p225_p13, %p224_p12 }
  0x1d   :  { %p227_p1 = pnand %p226_p0, %p220_p11 }
  0x1f   :  { %230 = shalt.err (!%p227_p1)
}
  0x20   :  { %s237_s0 = smov 128   ;;  %s238_s15 = smov 8  }
  0x21   :  { %34 = dma.hbm_to_vmem [thread:$0]  %s316_s1, 256, %s272_s21, [#allocation6], %s237_s0, %s237_s0, %s238_s15  }
  0x22   :  { %231 = dma.done.wait [#allocation4], 128  }
  0x23   :  { %232 = vsyncadd [#allocation4], 4294967168 }
  0x24   :  { %233 = dma.done.wait [#allocation6], 256  }
  0x25   :  { %234 = vsyncadd [#allocation6], 4294967040  ;;  %v239_v0 = vmov 0.0|0.0   ;;  %vm240_vm0 = vmmov 0   ;;  %v241_v1 = vmov 0.0   ;;  %v48_v2 = vld [vmem:[#allocation5] sm:$0xff]  ;;  %v143_v13 = vstv %s319_s4 }
  0x26   :  { %173 = vmatprep.subr.bf16.mxu0 %v239_v0  ;;  %170 = vmatprep.mubr.msk.f32.mxu0 %vm240_vm0, %v241_v1  ;;  %v49_v3 = vld [vmem:[#allocation5 + $0x8] sm:$0xff]  ;;  %v47_v5 = vld [vmem:[#allocation3] sm:$0xff]  ;;  %vm57_vm1 = vcmask 130048   ;;  %vm151_vm2 = vcmask 7168  }
  0x27   :  { %v174_v4 = vpack.c.bf16 %v49_v3, %v48_v2  ;;  %v159_v6 = vld [vmem:[%s317_s2] ss:$0 sm:$0xff] }
  0x28   :  { %v161_v10 = vld [vmem:[%s318_s3] ss:$0 sm:$0xff] }
  0x29   :  { %175 = vmatpush3.bf16.msra.mxu0 %v174_v4 }
  0x2c   :  { %171 = vmatmul.mubr.msk.f32.vlgmr.msra.gmra.mrb[0].mxu0 %vm57_vm1, %v47_v5 }
  0xff   :  { %v127_v7 = vpop.f32.mrb[0].mxu0 }
 0x100   :  { %v128_v8 = vadd.f32 %v159_v6, %v127_v7  ;;  %v172_v9 = vpop.f32.mrb[1].mxu0 }
 0x102   :  { %v131_v11 = vmax.f32 %v128_v8, 0.0 }
 0x104   :  { %v139_v12 = vmul.f32 %v161_v10, %v131_v11 }
 0x106   :  { %140 = vadd.xlane.f32.xlu0 %v139_v12 }
 0x193   :  { %v141_v14 = vpop.xlane.xlu0 %140 }
 0x194   :  { %v144_v15 = vadd.f32 %v143_v13, %v141_v14 }
 0x196   :  { %v162_v16 = vmul.f32 -1.442695, %v144_v15 }
 0x198   :  { %183 = vpow2.f32 %v162_v16 }
 0x1a2   :  { %v184_v17 = vpop.eup %183 }
 0x1a3   :  { %v148_v18 = vadd.f32 1.0, %v184_v17 }
 0x1a5   :  { %185 = vrcp.f32 %v148_v18 }
 0x1af   :  { %v186_v19 = vpop.eup %185 }
 0x1b0   :  { %152 = vst.msk [vmem:[%s320_s5] sm:$0xff] %vm151_vm2, %v186_v19 }
 0x1b1   :  { %157 = vsyncpa [#allocation4], 1 }
 0x1b2   :  { %158 = vsyncpa [#allocation6], 1 }

</bundles_post_ra>
